<compile_context>
chip_gen: v6e
topology: v6e:2x2x1
jax: 0.10.0
libtpu: 0.0.40
codegen_flags: <defaults>
</compile_context>

<pallas_src>
import functools

import jax
import jax.numpy as jnp
from jax.experimental import pallas as pl
from jax.experimental.pallas import tpu as pltpu

_MIN_PALLAS_ELEMENTS = 1 << 15    # below ~32K elements plain XLA is cheaper
_SUBLANE_U8 = 32                  # uint8 packs 32 sublanes per vreg


# ----------------------------------------------------------------------------
# Tiling helpers
# ----------------------------------------------------------------------------

_BLOCK_BYTES = None


def _default_block_bytes():
    """~4 MiB of f32 output per grid step everywhere (fits v5e's 16 MiB default
    scoped VMEM double-buffered); ~8 MiB on v7x-class chips, whose ~3.2 TB/s
    HBM makes the ~0.35 us/step overhead visible (review feedback)."""
    global _BLOCK_BYTES
    if _BLOCK_BYTES is None:
        blk = 4 << 20
        try:
            vmem = int(getattr(pltpu.get_tpu_info(), "vmem_capacity_bytes", 0))
            if 0 < vmem <= (64 << 20):       # v7x-class: 64 MiB VMEM per TC
                blk = 8 << 20
        except Exception:
            pass
        _BLOCK_BYTES = blk
    return _BLOCK_BYTES


def _best_2d_view(n):
    """Pick (rows, lane) with rows * lane == n.

    Prefer the largest lane width <= 4096 that divides n AND is a multiple of
    128 (unmasked full-width vst); otherwise the largest divisor <= 4096 so the
    masked tail of each row is a small fraction (review: odd-width images)."""
    best_any = 1
    for w in range(min(n, 4096), 0, -1):
        if n % w == 0:
            if best_any == 1:
                best_any = w              # largest divisor of any alignment
            if w % 128 == 0:
                return n // w, w          # largest lane-aligned divisor
    return n // best_any, best_any


def _pick_tile_rows(rows, out_bytes_per_row, block_bytes, sublane=_SUBLANE_U8):
    """Row-tile height: a multiple of `sublane`, ~block_bytes of f32 output per
    step, and capped near rows/4 so the 'parallel' grid axis keeps >=~4 steps
    to shard across v7x's two TensorCores (review feedback)."""
    if rows <= sublane:
        return rows                       # full extent; single step
    target = max(1, block_bytes // max(1, out_bytes_per_row))
    target = min(target, -(-rows // 4))   # keep roughly >= 4 grid steps
    tile = max(sublane, (target // sublane) * sublane)
    return min(tile, rows)


def _compiler_params(in_block_bytes, out_block_bytes):
    """vmem_limit_bytes sized from the double-buffered tiles with headroom;
    stays well under v7x's 64 MiB physical VMEM (review feedback)."""
    resident = 2 * (in_block_bytes + out_block_bytes)
    limit = int(min(48 << 20, max(16 << 20, resident + (resident >> 1) + (2 << 20))))
    return pltpu.CompilerParams(
        dimension_semantics=("parallel",),   # independent row tiles -> megacore
        vmem_limit_bytes=limit)


# ----------------------------------------------------------------------------
# Kernels
# ----------------------------------------------------------------------------

def _cast_scale_kernel(x_ref, o_ref):
    # Elementwise hot path: uint8 -> float32, true /255 (bit-parity with
    # to_tensor; still fully hidden under the HBM roofline).
    o_ref[...] = x_ref[...].astype(jnp.float32) / jnp.float32(255.0)


@functools.lru_cache(maxsize=None)
def _make_rgba_kernel(shifts):
    """One RGBA pixel per int32 lane; channels via shift+mask on the VPU.
    Masking after the (possibly arithmetic) shift makes sign-extension safe."""
    def kernel(x_ref, o_ref):
        w = x_ref[...]
        for c, sh in enumerate(shifts):
            byte = (w >> sh) & 0xFF
            o_ref[c] = byte.astype(jnp.float32) / jnp.float32(255.0)
    return kernel


@functools.lru_cache(maxsize=None)
def _make_deinterleave_kernel(width, channels):
    """Fused HWC->CHW: channel c is every `channels`-th lane of the resident
    (tile_h, W*C) uint8 block (lane-strided read, hides under the DMA)."""
    def kernel(x_ref, o_ref):
        for c in range(channels):
            xc = x_ref[:, pl.ds(c, width, stride=channels)]
            o_ref[c] = xc.astype(jnp.float32) / jnp.float32(255.0)
    return kernel


# ----------------------------------------------------------------------------
# pallas_call wrappers
# ----------------------------------------------------------------------------

def _cast_scale_pallas(x_u8, *, block_bytes=None):
    """uint8 array of any shape -> float32 / 255, same shape, streamed through
    a lane-dense 2D view."""
    if block_bytes is None:
        block_bytes = _default_block_bytes()
    n = x_u8.size
    rows, lane = _best_2d_view(n)
    x2d = x_u8.reshape(rows, lane)
    tile_r = _pick_tile_rows(rows, out_bytes_per_row=4 * lane, block_bytes=block_bytes)
    out = pl.pallas_call(
        _cast_scale_kernel,
        out_shape=jax.ShapeDtypeStruct((rows, lane), jnp.float32),
        grid=(pl.cdiv(rows, tile_r),),
        in_specs=[pl.BlockSpec((tile_r, lane), lambda i: (i, 0))],
        out_specs=pl.BlockSpec((tile_r, lane), lambda i: (i, 0)),
        compiler_params=_compiler_params(tile_r * lane, 4 * tile_r * lane),
    )(x2d)
    return out.reshape(x_u8.shape)


_RGBA_SHIFTS = None


def _rgba_shifts():
    """Byte order of lax.bitcast_convert_type(u8[...,4] -> i32), checked once
    on the device so channel extraction is endianness-proof."""
    global _RGBA_SHIFTS
    if _RGBA_SHIFTS is None:
        w = jax.lax.bitcast_convert_type(
            jnp.array([[0, 1, 2, 3]], dtype=jnp.uint8), jnp.int32)
        _RGBA_SHIFTS = (0, 8, 16, 24) if int(w[0]) == 0x03020100 else (24, 16, 8, 0)
    return _RGBA_SHIFTS


def _rgba_fused_pallas(x_hwc, *, block_bytes=None):
    """uint8 (H, W, 4) -> float32 (4, H, W): fused transpose + cast.  The HWC
    bytes are bitcast to one int32 pixel per lane so the image is read from
    HBM exactly once and channels fall out of VPU shift/mask."""
    if block_bytes is None:
        block_bytes = _default_block_bytes()
    H, W, C = x_hwc.shape
    assert C == 4
    xi32 = jax.lax.bitcast_convert_type(x_hwc, jnp.int32)      # (H, W) int32
    rows, lane = _best_2d_view(H * W)
    x2d = xi32.reshape(rows, lane)
    tile_r = _pick_tile_rows(rows, out_bytes_per_row=16 * lane, block_bytes=block_bytes)
    out = pl.pallas_call(
        _make_rgba_kernel(_rgba_shifts()),
        out_shape=jax.ShapeDtypeStruct((4, rows, lane), jnp.float32),
        grid=(pl.cdiv(rows, tile_r),),
        in_specs=[pl.BlockSpec((tile_r, lane), lambda i: (i, 0))],
        out_specs=pl.BlockSpec((4, tile_r, lane), lambda i: (0, i, 0)),
        compiler_params=_compiler_params(4 * tile_r * lane, 16 * tile_r * lane),
    )(x2d)
    return out.reshape(4, H, W)


def _deinterleave_pallas(x_hwc, *, block_bytes=None):
    """uint8 (H, W, C) -> float32 (C, H, W): fused transpose + cast via
    lane-strided channel extraction from a resident (tile_h, W*C) block."""
    if block_bytes is None:
        block_bytes = _default_block_bytes()
    H, W, C = x_hwc.shape
    x2d = x_hwc.reshape(H, W * C)                               # free reshape
    tile_h = _pick_tile_rows(H, out_bytes_per_row=4 * W * C, block_bytes=block_bytes)
    out = pl.pallas_call(
        _make_deinterleave_kernel(W, C),
        out_shape=jax.ShapeDtypeStruct((C, H, W), jnp.float32),
        grid=(pl.cdiv(H, tile_h),),
        in_specs=[pl.BlockSpec((tile_h, W * C), lambda i: (i, 0))],
        out_specs=pl.BlockSpec((C, tile_h, W), lambda i: (0, i, 0)),
        compiler_params=_compiler_params(tile_h * W * C, 4 * C * tile_h * W),
    )(x2d)
    return out


_DEINTERLEAVE_OK = {}


def _deinterleave_supported(channels):
    """One-time probe per channel count: compile + numerically validate the
    lane-strided fused kernel on the real backend.  If Mosaic rejects the
    strided read (or it miscomputes), fall back to transpose + cast."""
    ok = _DEINTERLEAVE_OK.get(channels)
    if ok is None:
        try:
            H, W = 64, 96
            x = (jnp.arange(H * W * channels, dtype=jnp.int32) % 256)
            x = x.astype(jnp.uint8).reshape(H, W, channels)
            got = _deinterleave_pallas(x, block_bytes=1 << 15)
            ref = jnp.transpose(x, (2, 0, 1)).astype(jnp.float32) / jnp.float32(255.0)
            ok = bool(jnp.allclose(got, ref, atol=1e-6))
        except Exception:
            ok = False
        _DEINTERLEAVE_OK[channels] = ok
    return ok


# ----------------------------------------------------------------------------
# Public forward
# ----------------------------------------------------------------------------

def convert_pil_image(x, dtype="float32", scale=True):
    """Pallas equivalent of ConvertPILImage.forward.

    uint8 HWC / 2D HW arrays (PIL-image stand-ins) -> CHW float32 in [0, 1].
    Non-uint8 inputs (already a tensor, float HWC, int8, ...) are returned
    unchanged, matching the original module's non-PIL branch -- callers that
    need the conversion must pass uint8.  `dtype`/`scale` behave like the
    original: float32 output either way, scaling always by 1/255.
    """
    # TODO(synk): the PIL.Image isinstance check and the try/except logging
    # wrapper have no array-level equivalent; modeled as a dtype dispatch.
    if x.dtype != jnp.uint8 or x.ndim not in (2, 3):
        return x

    if x.ndim == 2:                       # 'L'-mode grayscale -> (H, W, 1)
        H, W = x.shape
        x_hwc = x.reshape(H, W, 1)        # pure reshape, no transpose (review)
    else:
        x_hwc = x
    H, W, C = x_hwc.shape
    n = H * W * C

    if n < _MIN_PALLAS_ELEMENTS:
        # Small-input fast path: Pallas launch/step overhead dwarfs the work.
        return jnp.transpose(x_hwc, (2, 0, 1)).astype(jnp.float32) / jnp.float32(255.0)

    if C == 1:
        # Grayscale: HWC->CHW is a pure reshape; stream the cast kernel only.
        return _cast_scale_pallas(x_hwc).reshape(1, H, W)

    if C == 4:
        # RGBA: fully fused transpose + cast (one int32 pixel per lane).
        return _rgba_fused_pallas(x_hwc)

    if _deinterleave_supported(C):
        # RGB (and other interleaved C): fused transpose + cast, bytes read
        # from HBM exactly once.
        return _deinterleave_pallas(x_hwc)

    # Fallback (only if the strided read fails to lower on this backend):
    # cheap uint8 HWC->CHW transpose in XLA, then the lane-dense cast kernel.
    # Costs ~2 extra bytes/elem of HBM traffic vs the fused path.
    x_chw = jnp.transpose(x_hwc, (2, 0, 1))
    return _cast_scale_pallas(x_chw)


class ConvertPILImage:
    """Drop-in mirror of the PyTorch module (forward == __call__)."""

    def __init__(self, dtype="float32", scale=True):
        self.dtype = dtype
        self.scale = scale

    def forward(self, x):
        return convert_pil_image(x, dtype=self.dtype, scale=self.scale)

    __call__ = forward


# ----------------------------------------------------------------------------
# Self-test
# ----------------------------------------------------------------------------

if __name__ == "__main__":
    key = jax.random.PRNGKey(0)
    ks = jax.random.split(key, 6)

    def rand_u8(k, shape):
        return jax.random.randint(k, shape, 0, 256, dtype=jnp.int32).astype(jnp.uint8)

    def ref_to_tensor(img_u8):
        img = img_u8 if img_u8.ndim == 3 else img_u8[:, :, None]
        return jnp.transpose(img, (2, 0, 1)).astype(jnp.float32) / jnp.float32(255.0)

    module = ConvertPILImage()

    # 1) RGBA image -> fused bitcast (int32-pixel-per-lane) kernel.
    x_rgba = rand_u8(ks[0], (96, 128, 4))
    y = jax.block_until_ready(module(x_rgba))
    assert y.shape == (4, 96, 128) and y.dtype == jnp.float32
    assert jnp.allclose(y, ref_to_tensor(x_rgba), atol=1e-6)

    # 2) RGB image -> fused lane-strided deinterleave (or validated fallback).
    x_rgb = rand_u8(ks[1], (96, 128, 3))
    y = jax.block_until_ready(module(x_rgb))
    assert y.shape == (3, 96, 128) and y.dtype == jnp.float32
    assert jnp.allclose(y, ref_to_tensor(x_rgb), atol=1e-6)

    # 3) Odd width (not a multiple of 128) RGB image.
    x_odd = rand_u8(ks[2], (40, 300, 3))
    y = jax.block_until_ready(module(x_odd))
    assert y.shape == (3, 40, 300) and y.dtype == jnp.float32
    assert jnp.allclose(y, ref_to_tensor(x_odd), atol=1e-6)

    # 4) Grayscale 'L'-mode image -> (1, H, W) via reshape-only path.
    x_gray = rand_u8(ks[3], (192, 256))
    y = jax.block_until_ready(module(x_gray))
    assert y.shape == (1, 192, 256) and y.dtype == jnp.float32
    assert jnp.allclose(y, ref_to_tensor(x_gray), atol=1e-6)

    # 5) Small image -> XLA fast path (below the Pallas threshold).
    x_small = rand_u8(ks[4], (16, 16, 3))
    y = jax.block_until_ready(module(x_small))
    assert y.shape == (3, 16, 16) and jnp.allclose(y, ref_to_tensor(x_small), atol=1e-6)

    # 6) Multi-step grids with partial last tiles (forced tiny block_bytes).
    x_multi = rand_u8(ks[5], (256, 257, 4))
    y = jax.block_until_ready(_rgba_fused_pallas(x_multi, block_bytes=1 << 15))
    assert jnp.allclose(y, ref_to_tensor(x_multi), atol=1e-6)
    x_flat = rand_u8(ks[5], (640, 512))
    y = jax.block_until_ready(_cast_scale_pallas(x_flat, block_bytes=1 << 15))
    assert jnp.allclose(y, x_flat.astype(jnp.float32) / 255.0, atol=1e-6)

    # 7) Pass-through: non-uint8 ("already a tensor") input returned unchanged.
    z = ref_to_tensor(x_small)
    assert module(z) is z

    print("KERNEL_OK")
</pallas_src>

<mosaic_0001>
module attributes {stable_mosaic.version = 11 : i64} {
  func.func @kernel(%arg0: i32, %arg1: memref<3x4096xi32, #tpu.memory_space<vmem>>, %arg2: memref<4x3x4096xf32, #tpu.memory_space<vmem>>) attributes {dimension_semantics = [#tpu.dimension_semantics<parallel>], iteration_bounds = array<i64: 1>, scalar_prefetch = 0 : i64, scratch_operands = 0 : i64, tpu.core_type = #tpu.core_type<tc>, window_params = [{transform_indices = @transform_0, window_bounds = array<i64: 3, 4096>}, {transform_indices = @transform_1, window_bounds = array<i64: 4, 3, 4096>}]} {
    %c0 = arith.constant 0 : index
    %c0_0 = arith.constant 0 : index
    %0 = vector.load %arg1[%c0, %c0_0] : memref<3x4096xi32, #tpu.memory_space<vmem>>, vector<3x4096xi32>
    %c0_i32 = arith.constant 0 : i32
    %1 = vector.broadcast %c0_i32 : i32 to vector<3x4096xi32>
    %2 = arith.shrsi %0, %1 : vector<3x4096xi32>
    %c255_i32 = arith.constant 255 : i32
    %3 = vector.broadcast %c255_i32 : i32 to vector<3x4096xi32>
    %4 = arith.andi %2, %3 : vector<3x4096xi32>
    %5 = arith.sitofp %4 : vector<3x4096xi32> to vector<3x4096xf32>
    %cst = arith.constant 2.550000e+02 : f32
    %6 = vector.broadcast %cst : f32 to vector<3x4096xf32>
    %7 = arith.divf %5, %6 : vector<3x4096xf32>
    %c0_1 = arith.constant 0 : index
    %c0_2 = arith.constant 0 : index
    %c0_3 = arith.constant 0 : index
    %8 = vector.load %arg2[%c0_1, %c0_2, %c0_3] : memref<4x3x4096xf32, #tpu.memory_space<vmem>>, vector<1x3x4096xf32>
    %9 = vector.shape_cast %8 : vector<1x3x4096xf32> to vector<3x4096xf32>
    %10 = vector.shape_cast %7 : vector<3x4096xf32> to vector<1x3x4096xf32>
    tpu.vector_store %arg2[%c0_1, %c0_2, %c0_3], %10 {strides = array<i32>} : memref<4x3x4096xf32, #tpu.memory_space<vmem>>, vector<1x3x4096xf32>,
    %c8_i32 = arith.constant 8 : i32
    %11 = vector.broadcast %c8_i32 : i32 to vector<3x4096xi32>
    %12 = arith.shrsi %0, %11 : vector<3x4096xi32>
    %c255_i32_4 = arith.constant 255 : i32
    %13 = vector.broadcast %c255_i32_4 : i32 to vector<3x4096xi32>
    %14 = arith.andi %12, %13 : vector<3x4096xi32>
    %15 = arith.sitofp %14 : vector<3x4096xi32> to vector<3x4096xf32>
    %cst_5 = arith.constant 2.550000e+02 : f32
    %16 = vector.broadcast %cst_5 : f32 to vector<3x4096xf32>
    %17 = arith.divf %15, %16 : vector<3x4096xf32>
    %c1 = arith.constant 1 : index
    %c0_6 = arith.constant 0 : index
    %c0_7 = arith.constant 0 : index
    %18 = vector.load %arg2[%c1, %c0_6, %c0_7] : memref<4x3x4096xf32, #tpu.memory_space<vmem>>, vector<1x3x4096xf32>
    %19 = vector.shape_cast %18 : vector<1x3x4096xf32> to vector<3x4096xf32>
    %20 = vector.shape_cast %17 : vector<3x4096xf32> to vector<1x3x4096xf32>
    tpu.vector_store %arg2[%c1, %c0_6, %c0_7], %20 {strides = array<i32>} : memref<4x3x4096xf32, #tpu.memory_space<vmem>>, vector<1x3x4096xf32>,
    %c16_i32 = arith.constant 16 : i32
    %21 = vector.broadcast %c16_i32 : i32 to vector<3x4096xi32>
    %22 = arith.shrsi %0, %21 : vector<3x4096xi32>
    %c255_i32_8 = arith.constant 255 : i32
    %23 = vector.broadcast %c255_i32_8 : i32 to vector<3x4096xi32>
    %24 = arith.andi %22, %23 : vector<3x4096xi32>
    %25 = arith.sitofp %24 : vector<3x4096xi32> to vector<3x4096xf32>
    %cst_9 = arith.constant 2.550000e+02 : f32
    %26 = vector.broadcast %cst_9 : f32 to vector<3x4096xf32>
    %27 = arith.divf %25, %26 : vector<3x4096xf32>
    %c2 = arith.constant 2 : index
    %c0_10 = arith.constant 0 : index
    %c0_11 = arith.constant 0 : index
    %28 = vector.load %arg2[%c2, %c0_10, %c0_11] : memref<4x3x4096xf32, #tpu.memory_space<vmem>>, vector<1x3x4096xf32>
    %29 = vector.shape_cast %28 : vector<1x3x4096xf32> to vector<3x4096xf32>
    %30 = vector.shape_cast %27 : vector<3x4096xf32> to vector<1x3x4096xf32>
    tpu.vector_store %arg2[%c2, %c0_10, %c0_11], %30 {strides = array<i32>} : memref<4x3x4096xf32, #tpu.memory_space<vmem>>, vector<1x3x4096xf32>,
    %c24_i32 = arith.constant 24 : i32
    %31 = vector.broadcast %c24_i32 : i32 to vector<3x4096xi32>
    %32 = arith.shrsi %0, %31 : vector<3x4096xi32>
    %c255_i32_12 = arith.constant 255 : i32
    %33 = vector.broadcast %c255_i32_12 : i32 to vector<3x4096xi32>
    %34 = arith.andi %32, %33 : vector<3x4096xi32>
    %35 = arith.sitofp %34 : vector<3x4096xi32> to vector<3x4096xf32>
    %cst_13 = arith.constant 2.550000e+02 : f32
    %36 = vector.broadcast %cst_13 : f32 to vector<3x4096xf32>
    %37 = arith.divf %35, %36 : vector<3x4096xf32>
    %c3 = arith.constant 3 : index
    %c0_14 = arith.constant 0 : index
    %c0_15 = arith.constant 0 : index
    %38 = vector.load %arg2[%c3, %c0_14, %c0_15] : memref<4x3x4096xf32, #tpu.memory_space<vmem>>, vector<1x3x4096xf32>
    %39 = vector.shape_cast %38 : vector<1x3x4096xf32> to vector<3x4096xf32>
    %40 = vector.shape_cast %37 : vector<3x4096xf32> to vector<1x3x4096xf32>
    tpu.vector_store %arg2[%c3, %c0_14, %c0_15], %40 {strides = array<i32>} : memref<4x3x4096xf32, #tpu.memory_space<vmem>>, vector<1x3x4096xf32>,
    return
  }
  func.func @transform_0(%arg0: i32) -> (i32, i32) {
    %c0_i32 = arith.constant 0 : i32
    %c0_i32_0 = arith.constant 0 : i32
    return %arg0, %c0_i32 : i32, i32
  }
  func.func @transform_1(%arg0: i32) -> (i32, i32, i32) {
    %c0_i32 = arith.constant 0 : i32
    %c0_i32_0 = arith.constant 0 : i32
    %c0_i32_1 = arith.constant 0 : i32
    return %c0_i32, %arg0, %c0_i32_0 : i32, i32, i32
  }
}

</mosaic_0001>

<bundles_post_ra>
// kernel: tpu_custom_call.1
= control target key start
LH: loop header
LB: loop body
LE: loop exit
PB: predicated region body
PF: predicated region fallthrough
CT: control target
= control target key end

     0   :  { %6 = vsyncpa [#allocation3], 0  ;;  %s436_s6 = smov [#allocation2]   ;;  %s738_s0 = inlined_call_operand.hbm [shape: s32[3,4096], index: 0, kind: input, shape index: {}]   ;;  %s739_s1 = inlined_call_operand.vmem [shape: f32[4,3,4096], index: 1, kind: output, shape index: {}]  }
   0x1   :  { %s13_s7 = sshll.u32 %s436_s6, 4  ;;  %s14_s7 = int_to_ptr.vmem [resolvable:$true] %s13_s7 }
   0x2   :  { %s422_s8 = scalar_lea.vmem %s14_s7, 2048  ;;  %p427_p1 = scmp.lt.s32.totalorder %s14_s7, %s14_s7 }
   0x3   :  { %p423_p0 = scmp.ne.s32.totalorder %s14_s7, %s422_s8  ;;  %p428_p2 = scmp.lt.s32.totalorder %s422_s8, %s422_s8 }
   0x5   :  { %p429_p3 = por %p428_p2, %p427_p1 }
   0x7   :  { %p430_p4 = pnand %p429_p3, %p423_p0 }
   0x9   :  { %433 = shalt.err (!%p430_p4)
}
   0xa   :  { %16 = dma.hbm_to_vmem [thread:$0]  %s738_s0, 2048, %s14_s7, [#allocation3]  }
   0xb   :  { %434 = dma.done.wait [#allocation3], 2048  }
   0xc   :  { %435 = vsyncadd [#allocation3], 4294965248  ;;  %v450_v0 = vld [vmem:[#allocation2] sm:$0x77]  ;;  %v452_v1 = vld [vmem:[#allocation2 + $0x8] sm:$0x77] }
   0xd   :  { %v454_v2 = vld [vmem:[#allocation2 + $0x10] sm:$0x77]  ;;  %v36_v3 = vand.u32 255, %v450_v0  ;;  %v37_v4 = vand.u32 255, %v452_v1  ;;  %v459_v6 = vld [vmem:[#allocation2 + $0x18] sm:$0x77] }
   0xe   :  { %v38_v5 = vand.u32 255, %v454_v2  ;;  %v101_v7 = vshra.s32 %v450_v0, 8  ;;  %v39_v8 = vand.u32 255, %v459_v6  ;;  %v463_v9 = vld [vmem:[#allocation2 + $0x20] sm:$0x77]  ;;  %v102_v11 = vshra.s32 %v452_v1, 8 }
   0xf   :  { %v465_v10 = vld [vmem:[#allocation2 + $0x28] sm:$0x77]  ;;  %v52_v12 = vcvt.s32.f32 %v36_v3  ;;  %v53_v13 = vcvt.s32.f32 %v37_v4  ;;  %v40_v15 = vand.u32 255, %v463_v9  ;;  %v469_v16 = vld [vmem:[#allocation2 + $0x30] sm:$0x77]  ;;  %v103_v62 = vshra.s32 %v454_v2, 8 }
  0x10   :  { %v54_v14 = vcvt.s32.f32 %v38_v5  ;;  %v471_v17 = vld [vmem:[#allocation2 + $0x38] sm:$0x77]  ;;  %v55_v18 = vcvt.s32.f32 %v39_v8  ;;  %v41_v19 = vand.u32 255, %v465_v10  ;;  %v42_v20 = vand.u32 255, %v469_v16  ;;  %v476_v22 = vld [vmem:[#allocation2 + $0x40] sm:$0x77] }
  0x11   :  { %v43_v21 = vand.u32 255, %v471_v17  ;;  %v69_v23 = vmul.f32 0.003921569, %v52_v12  ;;  %v70_v24 = vmul.f32 0.003921569, %v53_v13  ;;  %v56_v26 = vcvt.s32.f32 %v40_v15 }
  0x12   :  { %v71_v25 = vmul.f32 0.003921569, %v54_v14  ;;  %v72_v27 = vmul.f32 0.003921569, %v55_v18  ;;  %v57_v28 = vcvt.s32.f32 %v41_v19  ;;  %v58_v29 = vcvt.s32.f32 %v42_v20  ;;  %v478_v31 = vld [vmem:[#allocation2 + $0x48] sm:$0x77] }
  0x13   :  { %v59_v30 = vcvt.s32.f32 %v43_v21  ;;  %v480_v32 = vld [vmem:[#allocation2 + $0x50] sm:$0x77]  ;;  %85 = vst [vmem:[%s739_s1] sm:$0x77] %v69_v23  ;;  %86 = vst [vmem:[%s739_s1 + $0x8] sm:$0x77] %v70_v24  ;;  %v44_v34 = vand.u32 255, %v476_v22 }
  0x14   :  { %87 = vst [vmem:[%s739_s1 + $0x10] sm:$0x77] %v71_v25  ;;  %v73_v33 = vmul.f32 0.003921569, %v56_v26  ;;  %v45_v35 = vand.u32 255, %v478_v31  ;;  %v46_v36 = vand.u32 255, %v480_v32 }
  0x15   :  { %88 = vst [vmem:[%s739_s1 + $0x18] sm:$0x77] %v72_v27  ;;  %v74_v37 = vmul.f32 0.003921569, %v57_v28  ;;  %v75_v38 = vmul.f32 0.003921569, %v58_v29  ;;  %v60_v40 = vcvt.s32.f32 %v44_v34 }
  0x16   :  { %v76_v39 = vmul.f32 0.003921569, %v59_v30  ;;  %89 = vst [vmem:[%s739_s1 + $0x20] sm:$0x77] %v73_v33  ;;  %v61_v41 = vcvt.s32.f32 %v45_v35  ;;  %v62_v42 = vcvt.s32.f32 %v46_v36  ;;  %v500_v43 = vld [vmem:[#allocation2 + $0x58] sm:$0x77] }
  0x17   :  { %v502_v44 = vld [vmem:[#allocation2 + $0x60] sm:$0x77]  ;;  %v504_v45 = vld [vmem:[#allocation2 + $0x68] sm:$0x77]  ;;  %90 = vst [vmem:[%s739_s1 + $0x28] sm:$0x77] %v74_v37 }
  0x18   :  { %91 = vst [vmem:[%s739_s1 + $0x30] sm:$0x77] %v75_v38  ;;  %92 = vst [vmem:[%s739_s1 + $0x38] sm:$0x77] %v76_v39  ;;  %v47_v46 = vand.u32 255, %v500_v43  ;;  %v48_v47 = vand.u32 255, %v502_v44 }
  0x19   :  { %v49_v48 = vand.u32 255, %v504_v45  ;;  %v518_v49 = vld [vmem:[#allocation2 + $0x70] sm:$0x77]  ;;  %v117_v50 = vand.u32 255, %v101_v7  ;;  %v77_v51 = vmul.f32 0.003921569, %v60_v40 }
  0x1a   :  { %v78_v52 = vmul.f32 0.003921569, %v61_v41  ;;  %v79_v53 = vmul.f32 0.003921569, %v62_v42  ;;  %v63_v54 = vcvt.s32.f32 %v47_v46  ;;  %v64_v55 = vcvt.s32.f32 %v48_v47  ;;  %v521_v58 = vld [vmem:[#allocation2 + $0x78] sm:$0x77] }
  0x1b   :  { %v65_v56 = vcvt.s32.f32 %v49_v48  ;;  %v50_v57 = vand.u32 255, %v518_v49  ;;  %93 = vst [vmem:[%s739_s1 + $0x40] sm:$0x77] %v77_v51  ;;  %v51_v59 = vand.u32 255, %v521_v58  ;;  %v133_v60 = vcvt.s32.f32 %v117_v50 }
  0x1c   :  { %94 = vst [vmem:[%s739_s1 + $0x48] sm:$0x77] %v78_v52  ;;  %95 = vst [vmem:[%s739_s1 + $0x50] sm:$0x77] %v79_v53  ;;  %v118_v61 = vand.u32 255, %v102_v11  ;;  %v119_v13 = vand.u32 255, %v103_v62 }
  0x1d   :  { %v80_v63 = vmul.f32 0.003921569, %v63_v54  ;;  %v81_v3 = vmul.f32 0.003921569, %v64_v55  ;;  %v82_v4 = vmul.f32 0.003921569, %v65_v56  ;;  %v66_v5 = vcvt.s32.f32 %v50_v57 }
  0x1e   :  { %v67_v7 = vcvt.s32.f32 %v51_v59  ;;  %v149_v8 = vmul.f32 0.003921569, %v133_v60  ;;  %v134_v12 = vcvt.s32.f32 %v118_v61  ;;  %v104_v14 = vshra.s32 %v459_v6, 8 }
  0x1f   :  { %96 = vst [vmem:[%s739_s1 + $0x58] sm:$0x77] %v80_v63  ;;  %97 = vst [vmem:[%s739_s1 + $0x60] sm:$0x77] %v81_v3  ;;  %v83_v11 = vmul.f32 0.003921569, %v66_v5  ;;  %v135_v21 = vcvt.s32.f32 %v119_v13 }
  0x20   :  { %98 = vst [vmem:[%s739_s1 + $0x68] sm:$0x77] %v82_v4  ;;  %v105_v15 = vshra.s32 %v463_v9, 8  ;;  %v106_v18 = vshra.s32 %v465_v10, 8  ;;  %v84_v19 = vmul.f32 0.003921569, %v67_v7 }
  0x21   :  { %349 = vst [vmem:[%s739_s1 + $0x80] sm:$0x77] %v149_v8  ;;  %v150_v20 = vmul.f32 0.003921569, %v134_v12  ;;  %v107_v23 = vshra.s32 %v469_v16, 8  ;;  %v120_v24 = vand.u32 255, %v104_v14 }
  0x22   :  { %99 = vst [vmem:[%s739_s1 + $0x70] sm:$0x77] %v83_v11  ;;  %v121_v25 = vand.u32 255, %v105_v15  ;;  %v122_v26 = vand.u32 255, %v106_v18  ;;  %v108_v27 = vshra.s32 %v471_v17, 8  ;;  %v109_v30 = vshra.s32 %v476_v22, 8 }
  0x23   :  { %100 = vst [vmem:[%s739_s1 + $0x78] sm:$0x77] %v84_v19  ;;  %350 = vst [vmem:[%s739_s1 + $0x88] sm:$0x77] %v150_v20  ;;  %v151_v28 = vmul.f32 0.003921569, %v135_v21  ;;  %v136_v34 = vcvt.s32.f32 %v120_v24 }
  0x24   :  { %v123_v29 = vand.u32 255, %v107_v23  ;;  %v110_v33 = vshra.s32 %v478_v31, 8  ;;  %v137_v35 = vcvt.s32.f32 %v121_v25  ;;  %v138_v36 = vcvt.s32.f32 %v122_v26 }
  0x25   :  { %v124_v37 = vand.u32 255, %v108_v27  ;;  %351 = vst [vmem:[%s739_s1 + $0x90] sm:$0x77] %v151_v28  ;;  %v125_v39 = vand.u32 255, %v109_v30  ;;  %v111_v41 = vshra.s32 %v480_v32, 8  ;;  %v112_v55 = vshra.s32 %v500_v43, 8 }
  0x26   :  { %v139_v38 = vcvt.s32.f32 %v123_v29  ;;  %v126_v40 = vand.u32 255, %v110_v33  ;;  %v152_v42 = vmul.f32 0.003921569, %v136_v34  ;;  %v153_v46 = vmul.f32 0.003921569, %v137_v35 }
  0x27   :  { %v154_v47 = vmul.f32 0.003921569, %v138_v36  ;;  %v140_v48 = vcvt.s32.f32 %v124_v37  ;;  %v141_v51 = vcvt.s32.f32 %v125_v39  ;;  %v127_v53 = vand.u32 255, %v111_v41 }
  0x28   :  { %v155_v50 = vmul.f32 0.003921569, %v139_v38  ;;  %v142_v52 = vcvt.s32.f32 %v126_v40  ;;  %352 = vst [vmem:[%s739_s1 + $0x98] sm:$0x77] %v152_v42  ;;  %353 = vst [vmem:[%s739_s1 + $0xa0] sm:$0x77] %v153_v46 }
  0x29   :  { %354 = vst [vmem:[%s739_s1 + $0xa8] sm:$0x77] %v154_v47  ;;  %v156_v54 = vmul.f32 0.003921569, %v140_v48  ;;  %v113_v56 = vshra.s32 %v502_v44, 8  ;;  %v114_v57 = vshra.s32 %v504_v45, 8  ;;  %v143_v61 = vcvt.s32.f32 %v127_v53 }
  0x2a   :  { %355 = vst [vmem:[%s739_s1 + $0xb0] sm:$0x77] %v155_v50  ;;  %v157_v59 = vmul.f32 0.003921569, %v141_v51  ;;  %v158_v60 = vmul.f32 0.003921569, %v142_v52 }
  0x2b   :  { %v115_v62 = vshra.s32 %v518_v49, 8  ;;  %356 = vst [vmem:[%s739_s1 + $0xb8] sm:$0x77] %v156_v54  ;;  %v128_v63 = vand.u32 255, %v112_v55  ;;  %v129_v3 = vand.u32 255, %v113_v56  ;;  %v130_v4 = vand.u32 255, %v114_v57 }
  0x2c   :  { %v116_v5 = vshra.s32 %v521_v58, 8  ;;  %357 = vst [vmem:[%s739_s1 + $0xc0] sm:$0x77] %v157_v59  ;;  %358 = vst [vmem:[%s739_s1 + $0xc8] sm:$0x77] %v158_v60  ;;  %v182_v12 = vshra.s32 %v450_v0, 16 }
  0x2d   :  { %v159_v7 = vmul.f32 0.003921569, %v143_v61  ;;  %v131_v8 = vand.u32 255, %v115_v62  ;;  %v183_v13 = vshra.s32 %v452_v1, 16  ;;  %v144_v11 = vcvt.s32.f32 %v128_v63 }
  0x2e   :  { %v145_v14 = vcvt.s32.f32 %v129_v3  ;;  %v146_v15 = vcvt.s32.f32 %v130_v4  ;;  %v132_v18 = vand.u32 255, %v116_v5  ;;  %v198_v20 = vand.u32 255, %v182_v12 }
  0x2f   :  { %359 = vst [vmem:[%s739_s1 + $0xd0] sm:$0x77] %v159_v7  ;;  %v147_v19 = vcvt.s32.f32 %v131_v8  ;;  %v199_v21 = vand.u32 255, %v183_v13  ;;  %v184_v23 = vshra.s32 %v454_v2, 16  ;;  %v160_v24 = vmul.f32 0.003921569, %v144_v11 }
  0x30   :  { %v161_v25 = vmul.f32 0.003921569, %v145_v14  ;;  %v162_v26 = vmul.f32 0.003921569, %v146_v15  ;;  %v148_v27 = vcvt.s32.f32 %v132_v18  ;;  %v214_v29 = vcvt.s32.f32 %v198_v20 }
  0x31   :  { %v163_v28 = vmul.f32 0.003921569, %v147_v19  ;;  %v215_v30 = vcvt.s32.f32 %v199_v21  ;;  %v200_v33 = vand.u32 255, %v184_v23  ;;  %360 = vst [vmem:[%s739_s1 + $0xd8] sm:$0x77] %v160_v24  ;;  %v185_v35 = vshra.s32 %v459_v6, 16 }
  0x32   :  { %361 = vst [vmem:[%s739_s1 + $0xe0] sm:$0x77] %v161_v25  ;;  %362 = vst [vmem:[%s739_s1 + $0xe8] sm:$0x77] %v162_v26  ;;  %v164_v34 = vmul.f32 0.003921569, %v148_v27 }
  0x33   :  { %v186_v36 = vshra.s32 %v463_v9, 16  ;;  %v187_v37 = vshra.s32 %v465_v10, 16  ;;  %363 = vst [vmem:[%s739_s1 + $0xf0] sm:$0x77] %v163_v28  ;;  %v230_v38 = vmul.f32 0.003921569, %v214_v29  ;;  %v216_v40 = vcvt.s32.f32 %v200_v33 }
  0x34   :  { %v231_v39 = vmul.f32 0.003921569, %v215_v30  ;;  %v188_v41 = vshra.s32 %v469_v16, 16  ;;  %364 = vst [vmem:[%s739_s1 + $0xf8] sm:$0x77] %v164_v34  ;;  %v201_v42 = vand.u32 255, %v185_v35 }
  0x35   :  { %v202_v46 = vand.u32 255, %v186_v36  ;;  %v203_v47 = vand.u32 255, %v187_v37  ;;  %v189_v48 = vshra.s32 %v471_v17, 16  ;;  %365 = vst [vmem:[%s739_s1 + $0x100] sm:$0x77] %v230_v38  ;;  %v190_v52 = vshra.s32 %v476_v22, 16 }
  0x36   :  { %366 = vst [vmem:[%s739_s1 + $0x108] sm:$0x77] %v231_v39  ;;  %v232_v50 = vmul.f32 0.003921569, %v216_v40  ;;  %v204_v51 = vand.u32 255, %v188_v41  ;;  %v191_v53 = vshra.s32 %v478_v31, 16  ;;  %v217_v54 = vcvt.s32.f32 %v201_v42 }
  0x37   :  { %v218_v55 = vcvt.s32.f32 %v202_v46  ;;  %v219_v56 = vcvt.s32.f32 %v203_v47  ;;  %v205_v57 = vand.u32 255, %v189_v48  ;;  %v206_v60 = vand.u32 255, %v190_v52 }
  0x38   :  { %367 = vst [vmem:[%s739_s1 + $0x110] sm:$0x77] %v232_v50  ;;  %v220_v59 = vcvt.s32.f32 %v204_v51  ;;  %v207_v61 = vand.u32 255, %v191_v53  ;;  %v192_v62 = vshra.s32 %v480_v32, 16  ;;  %v233_v63 = vmul.f32 0.003921569, %v217_v54 }
  0x39   :  { %v234_v3 = vmul.f32 0.003921569, %v218_v55  ;;  %v235_v4 = vmul.f32 0.003921569, %v219_v56  ;;  %v221_v5 = vcvt.s32.f32 %v205_v57  ;;  %v222_v8 = vcvt.s32.f32 %v206_v60 }
  0x3a   :  { %v236_v7 = vmul.f32 0.003921569, %v220_v59  ;;  %v223_v12 = vcvt.s32.f32 %v207_v61  ;;  %v208_v13 = vand.u32 255, %v192_v62  ;;  %368 = vst [vmem:[%s739_s1 + $0x118] sm:$0x77] %v233_v63  ;;  %v193_v14 = vshra.s32 %v500_v43, 16 }
  0x3b   :  { %369 = vst [vmem:[%s739_s1 + $0x120] sm:$0x77] %v234_v3  ;;  %370 = vst [vmem:[%s739_s1 + $0x128] sm:$0x77] %v235_v4  ;;  %v237_v11 = vmul.f32 0.003921569, %v221_v5 }
  0x3c   :  { %v194_v15 = vshra.s32 %v502_v44, 16  ;;  %v195_v18 = vshra.s32 %v504_v45, 16  ;;  %371 = vst [vmem:[%s739_s1 + $0x130] sm:$0x77] %v236_v7  ;;  %v238_v19 = vmul.f32 0.003921569, %v222_v8  ;;  %v224_v21 = vcvt.s32.f32 %v208_v13 }
  0x3d   :  { %v239_v20 = vmul.f32 0.003921569, %v223_v12  ;;  %v196_v23 = vshra.s32 %v518_v49, 16  ;;  %372 = vst [vmem:[%s739_s1 + $0x138] sm:$0x77] %v237_v11  ;;  %v209_v24 = vand.u32 255, %v193_v14 }
  0x3e   :  { %v210_v25 = vand.u32 255, %v194_v15  ;;  %v211_v26 = vand.u32 255, %v195_v18  ;;  %v197_v27 = vshra.s32 %v521_v58, 16  ;;  %373 = vst [vmem:[%s739_s1 + $0x140] sm:$0x77] %v238_v19  ;;  %v381_v30 = vshrl.u32 %v450_v0, 24 }
  0x3f   :  { %374 = vst [vmem:[%s739_s1 + $0x148] sm:$0x77] %v239_v20  ;;  %v240_v28 = vmul.f32 0.003921569, %v224_v21  ;;  %v212_v29 = vand.u32 255, %v196_v23  ;;  %v382_v33 = vshrl.u32 %v452_v1, 24  ;;  %v225_v34 = vcvt.s32.f32 %v209_v24 }
  0x40   :  { %v226_v35 = vcvt.s32.f32 %v210_v25  ;;  %v227_v36 = vcvt.s32.f32 %v211_v26  ;;  %v213_v37 = vand.u32 255, %v197_v27  ;;  %v295_v39 = vcvt.s32.f32 %v381_v30 }
  0x41   :  { %375 = vst [vmem:[%s739_s1 + $0x150] sm:$0x77] %v240_v28  ;;  %v228_v38 = vcvt.s32.f32 %v212_v29  ;;  %v296_v40 = vcvt.s32.f32 %v382_v33  ;;  %v383_v41 = vshrl.u32 %v454_v2, 24  ;;  %v241_v42 = vmul.f32 0.003921569, %v225_v34 }
  0x42   :  { %v242_v46 = vmul.f32 0.003921569, %v226_v35  ;;  %v243_v47 = vmul.f32 0.003921569, %v227_v36  ;;  %v229_v48 = vcvt.s32.f32 %v213_v37  ;;  %v311_v50 = vmul.f32 0.003921569, %v295_v39 }
  0x43   :  { %v244_v0 = vmul.f32 0.003921569, %v228_v38  ;;  %v312_v1 = vmul.f32 0.003921569, %v296_v40  ;;  %v297_v51 = vcvt.s32.f32 %v383_v41  ;;  %376 = vst [vmem:[%s739_s1 + $0x158] sm:$0x77] %v241_v42 }
  0x44   :  { %377 = vst [vmem:[%s739_s1 + $0x160] sm:$0x77] %v242_v46  ;;  %378 = vst [vmem:[%s739_s1 + $0x168] sm:$0x77] %v243_v47  ;;  %v245_v2 = vmul.f32 0.003921569, %v229_v48 }
  0x45   :  { %v384_v52 = vshrl.u32 %v459_v6, 24  ;;  %v385_v53 = vshrl.u32 %v463_v9, 24  ;;  %v386_v54 = vshrl.u32 %v465_v10, 24  ;;  %379 = vst [vmem:[%s739_s1 + $0x170] sm:$0x77] %v244_v0  ;;  %v387_v56 = vshrl.u32 %v469_v16, 24 }
  0x46   :  { %397 = vst [vmem:[%s739_s1 + $0x180] sm:$0x77] %v311_v50  ;;  %398 = vst [vmem:[%s739_s1 + $0x188] sm:$0x77] %v312_v1  ;;  %v313_v55 = vmul.f32 0.003921569, %v297_v51 }
  0x47   :  { %v388_v6 = vshrl.u32 %v471_v17, 24  ;;  %v389_v9 = vshrl.u32 %v476_v22, 24  ;;  %380 = vst [vmem:[%s739_s1 + $0x178] sm:$0x77] %v245_v2  ;;  %v298_v10 = vcvt.s32.f32 %v384_v52  ;;  %v299_v57 = vcvt.s32.f32 %v385_v53 }
  0x48   :  { %v300_v59 = vcvt.s32.f32 %v386_v54  ;;  %v390_v60 = vshrl.u32 %v478_v31, 24  ;;  %399 = vst [vmem:[%s739_s1 + $0x190] sm:$0x77] %v313_v55  ;;  %v301_v61 = vcvt.s32.f32 %v387_v56  ;;  %v391_v17 = vshrl.u32 %v480_v32, 24 }
  0x49   :  { %v302_v62 = vcvt.s32.f32 %v388_v6  ;;  %v303_v16 = vcvt.s32.f32 %v389_v9  ;;  %v314_v63 = vmul.f32 0.003921569, %v298_v10  ;;  %v315_v22 = vmul.f32 0.003921569, %v299_v57 }
  0x4a   :  { %v316_v3 = vmul.f32 0.003921569, %v300_v59  ;;  %v304_v4 = vcvt.s32.f32 %v390_v60  ;;  %v317_v5 = vmul.f32 0.003921569, %v301_v61  ;;  %v305_v12 = vcvt.s32.f32 %v391_v17 }
  0x4b   :  { %v318_v7 = vmul.f32 0.003921569, %v302_v62  ;;  %v319_v8 = vmul.f32 0.003921569, %v303_v16  ;;  %400 = vst [vmem:[%s739_s1 + $0x198] sm:$0x77] %v314_v63 }
  0x4c   :  { %401 = vst [vmem:[%s739_s1 + $0x1a0] sm:$0x77] %v315_v22  ;;  %402 = vst [vmem:[%s739_s1 + $0x1a8] sm:$0x77] %v316_v3  ;;  %v320_v31 = vmul.f32 0.003921569, %v304_v4 }
  0x4d   :  { %v392_v32 = vshrl.u32 %v500_v43, 24  ;;  %v393_v13 = vshrl.u32 %v502_v44, 24  ;;  %v394_v11 = vshrl.u32 %v504_v45, 24  ;;  %403 = vst [vmem:[%s739_s1 + $0x1b0] sm:$0x77] %v317_v5  ;;  %v395_v15 = vshrl.u32 %v518_v49, 24 }
  0x4e   :  { %404 = vst [vmem:[%s739_s1 + $0x1b8] sm:$0x77] %v318_v7  ;;  %405 = vst [vmem:[%s739_s1 + $0x1c0] sm:$0x77] %v319_v8  ;;  %v321_v14 = vmul.f32 0.003921569, %v305_v12 }
  0x4f   :  { %v396_v43 = vshrl.u32 %v521_v58, 24  ;;  %406 = vst [vmem:[%s739_s1 + $0x1c8] sm:$0x77] %v320_v31  ;;  %v306_v44 = vcvt.s32.f32 %v392_v32  ;;  %v307_v45 = vcvt.s32.f32 %v393_v13  ;;  %v308_v18 = vcvt.s32.f32 %v394_v11 }
  0x50   :  { %407 = vst [vmem:[%s739_s1 + $0x1d0] sm:$0x77] %v321_v14  ;;  %v309_v19 = vcvt.s32.f32 %v395_v15 }
  0x51   :  { %v310_v20 = vcvt.s32.f32 %v396_v43  ;;  %v322_v21 = vmul.f32 0.003921569, %v306_v44  ;;  %v323_v23 = vmul.f32 0.003921569, %v307_v45  ;;  %v324_v24 = vmul.f32 0.003921569, %v308_v18 }
  0x52   :  { %v325_v25 = vmul.f32 0.003921569, %v309_v19 }
  0x53   :  { %v326_v49 = vmul.f32 0.003921569, %v310_v20  ;;  %408 = vst [vmem:[%s739_s1 + $0x1d8] sm:$0x77] %v322_v21  ;;  %409 = vst [vmem:[%s739_s1 + $0x1e0] sm:$0x77] %v323_v23 }
  0x54   :  { %410 = vst [vmem:[%s739_s1 + $0x1e8] sm:$0x77] %v324_v24  ;;  %411 = vst [vmem:[%s739_s1 + $0x1f0] sm:$0x77] %v325_v25 }
  0x55   :  { %412 = vst [vmem:[%s739_s1 + $0x1f8] sm:$0x77] %v326_v49 }
  0x56   :  { %348 = vsyncpa [#allocation3], 1 }

</bundles_post_ra>
